<compile_context>
chip_gen: v5e
topology: v5e:2x2
jax: 0.10.0
libtpu: 0.0.40
codegen_flags: <defaults>
</compile_context>

<pallas_src>
import math
import functools

import jax
import jax.numpy as jnp
from jax.experimental import pallas as pl
from jax.experimental.pallas import tpu as pltpu


def _round_up(x, m):
    return (x + m - 1) // m * m


def _vmem_capacity_bytes():
    """Per-core VMEM capacity; conservative 64 MiB (v7x per-core) fallback."""
    try:
        cap = getattr(pltpu.get_tpu_info(), "vmem_capacity_bytes", None)
        if cap:
            return int(cap)
    except Exception:
        pass
    return 64 << 20


def _pick_tn(out_features, in_features):
    """Class-tile width.

    Prefer multiples of 256 (full MXU pass width on v6e/v7x; 128 is the v5e
    floor) that divide C exactly (so the logits need no padded-output slice),
    capped so one (D, tn) bf16 weight tile stays <= ~4 MiB of VMEM.
    """
    max_tn = max(128, ((4 << 20) // (2 * in_features)) // 128 * 128)
    for tn in (1024, 512, 256):
        if tn <= max_tn and out_features % tn == 0:
            return tn
    if out_features % 128 == 0:
        return 128
    return min(256 if out_features >= 256 else 128, max_tn)


def _arcface_tile_kernel(ex_ref, wt_ref, lab_ref, delta_ref, out_ref, *,
                         scale, tn):
    """Compute one (tm, tn) tile of scaled ArcFace logits.

    ex_ref:    (tm, D)  bf16  L2-normalized input rows (pre-normalized).
    wt_ref:    (D, tn)  bf16  L2-normalized, transposed, PRE-SCALED weight tile.
    lab_ref:   (tm, 1)  int32 global class label per row.
    delta_ref: (tm, 1)  f32   pre-scaled margin correction for the label col.
    out_ref:   (tm, tn) f32   clip(scale*cos, +-scale), plus delta at label col.
    """
    j = pl.program_id(0)                                   # class-tile index
    scos = jnp.dot(ex_ref[...], wt_ref[...],
                   preferred_element_type=jnp.float32)     # MXU, pre-scaled
    # Matches the reference's cos(arccos(clip(cos, -1, 1))) == clip(cos).
    scos = jnp.clip(scos, -scale, scale)
    # Tile-local one-hot: compare a local column iota against (label - j*tn);
    # avoids materializing a global (tm, tn) int32 column-index add per tile.
    local_lab = lab_ref[...] - j * tn                      # (tm, 1)
    col = jax.lax.broadcasted_iota(jnp.int32, scos.shape, 1)
    out_ref[...] = scos + jnp.where(col == local_lab, delta_ref[...],
                                    jnp.float32(0.0))


class ArcFacePallas:
    def __init__(self, in_features, out_features, scale, margin,
                 with_theta, clip_thresh, clip_value, with_weight,
                 key=jax.random.PRNGKey(0)):
        self.in_features = in_features
        self.out_features = out_features
        self.scale = float(scale)
        self.margin = float(margin)
        self.with_theta = with_theta
        self.clip_thresh = clip_thresh   # unused in forward (matches PyTorch)
        self.clip_value = clip_value     # unused in forward (matches PyTorch)
        self.with_weight = with_weight
        self.thresh = math.cos(math.pi - self.margin)
        self.mm = math.sin(math.pi - self.margin) * self.margin

        # Deterministic init matching reset_parameters(): U(-stdv, stdv).
        stdv = 1.0 / math.sqrt(in_features)
        self.weight = jax.random.uniform(
            key, (out_features, in_features), dtype=jnp.float32,
            minval=-stdv, maxval=stdv)

        # One-time (init, not per-call) prep of the streamed weight:
        # L2-normalize rows, fold the ArcFace `scale` in, transpose to (D, C)
        # so the class axis is lane-dense, cast to bf16, pad the class axis to
        # the tile width.  Only this bf16 copy and the raw f32 parameter live
        # in HBM (no persistent f32-normalized copy).
        self._tn = _pick_tn(out_features, in_features)
        self._c_pad = _round_up(out_features, self._tn)
        w_norm = self.weight * jax.lax.rsqrt(
            jnp.sum(self.weight * self.weight, axis=1, keepdims=True))
        wt = jnp.zeros((in_features, self._c_pad), dtype=jnp.bfloat16)
        self._w_scaled_t = wt.at[:, :out_features].set(
            (self.scale * w_norm).T.astype(jnp.bfloat16))

    def __call__(self, x, label):
        B, D = x.shape
        C = self.out_features
        assert D == self.in_features
        label = label.astype(jnp.int32)

        # ---- O(B*D) glue in plain JAX (hoisted out of the tile body) -------
        x_f32 = x.astype(jnp.float32)
        ex = x_f32 * jax.lax.rsqrt(jnp.sum(x_f32 * x_f32, axis=1,
                                           keepdims=True))       # (B, D) f32

        # cos at the label column: gather B rows of the raw weight and
        # normalize them on the fly (no extra full-size weight copy in HBM).
        w_lab = self.weight[label]                                # (B, D)
        w_lab = w_lab * jax.lax.rsqrt(jnp.sum(w_lab * w_lab, axis=1,
                                              keepdims=True))
        coslab = jnp.sum(ex * w_lab, axis=1)                      # (B,) f32
        coslab_c = jnp.clip(coslab, -1.0, 1.0)
        cos_m, sin_m = math.cos(self.margin), math.sin(self.margin)
        sin_lab = jnp.sqrt(jnp.maximum(1.0 - coslab_c * coslab_c, 0.0))
        shifted = coslab_c * cos_m - sin_lab * sin_m              # cos(th+m)
        # Pre-scaled additive correction applied at the label column only.
        # (Branch decided on the f32 coslab; the in-kernel base cos is bf16,
        #  so rows with coslab ~= thresh may differ marginally — acceptable.)
        delta = jnp.where(coslab > self.thresh,
                          self.scale * (shifted - coslab_c),
                          jnp.float32(-self.scale * self.mm))     # (B,)

        # ---- tiling ---------------------------------------------------------
        tn, c_pad = self._tn, self._c_pad
        cap = _vmem_capacity_bytes()
        budget = int(cap * 0.70)         # leave compiler scratch/spill headroom

        # Batch tile: as large as VMEM allows (<= 1024), multiple of 16 so the
        # bf16 ex tile packs sublanes fully.  Larger tm = fewer grid steps and
        # fewer re-reads of the (small) ex operand.
        per_row = 2 * D * 2 + 2 * tn * 4 + 16        # ex + out + label/delta
        w_bytes = 2 * D * tn * 2
        tm_cap = max((budget - w_bytes - (2 << 20)) // per_row, 16)
        tm = min(_round_up(B, 16), 1024, (tm_cap // 16) * 16)
        tm = max(tm, 16)
        b_pad = _round_up(B, tm)
        n_bt, n_ct = b_pad // tm, c_pad // tn

        ex_b = ex.astype(jnp.bfloat16)
        if b_pad != B:
            ex_b = jnp.pad(ex_b, ((0, b_pad - B), (0, 0)))
            label = jnp.pad(label, (0, b_pad - B))
            delta = jnp.pad(delta, (0, b_pad - B))
        lab2d = label.reshape(b_pad, 1)
        delta2d = delta.reshape(b_pad, 1).astype(jnp.float32)

        # Grid = (class, batch) with batch innermost: each (D, tn) weight tile
        # is fetched once and stays resident while batch tiles iterate under
        # it; on v7x megacore the "parallel" class axis is split across the two
        # TensorCores, so the full weight is streamed from shared HBM exactly
        # once in total.
        # TODO(synk): for very large in_features (>= 4-8K) add a K grid axis
        # with an f32 VMEM accumulator instead of a full-D weight tile.
        n_wbuf = 2
        w_spec = pl.BlockSpec((D, tn), lambda j, i: (0, j))
        if n_bt == 1 and n_ct >= 3 and 3 * D * tn * 2 <= budget // 4:
            # Weight tile changes every step: deepen its pipeline (v5e/v6e
            # have spare VMEM; the guard keeps v7x inside its 64 MiB budget).
            n_wbuf = 3
            w_spec = pl.BlockSpec((D, tn), lambda j, i: (0, j),
                                  pipeline_mode=pl.Buffered(3))

        vmem_est = (2 * tm * D * 2 + n_wbuf * D * tn * 2
                    + 2 * tm * tn * 4 + 2 * tm * 8 + (2 << 20))
        vmem_limit = int(min(max(vmem_est, 16 << 20), int(cap * 0.85)))

        kernel = functools.partial(_arcface_tile_kernel,
                                   scale=self.scale, tn=tn)

        logits_p = pl.pallas_call(
            kernel,
            grid=(n_ct, n_bt),
            in_specs=[
                pl.BlockSpec((tm, D), lambda j, i: (i, 0)),   # ex (bf16)
                w_spec,                                        # scaled W^T
                pl.BlockSpec((tm, 1), lambda j, i: (i, 0)),   # label column
                pl.BlockSpec((tm, 1), lambda j, i: (i, 0)),   # margin delta
            ],
            out_specs=pl.BlockSpec((tm, tn), lambda j, i: (i, j)),
            out_shape=jax.ShapeDtypeStruct((b_pad, c_pad), jnp.float32),
            compiler_params=pltpu.CompilerParams(
                dimension_semantics=("parallel", "arbitrary"),
                vmem_limit_bytes=vmem_limit),
        )(ex_b, self._w_scaled_t, lab2d, delta2d)

        # Common case (C a multiple of the class tile, B a multiple of the
        # batch tile): no padding exists and no post-slice HBM pass is paid.
        logits = (logits_p if (b_pad == B and c_pad == C)
                  else logits_p[:B, :C])

        out = {"logits": logits}
        if self.with_theta:
            # Per-sample angle in degrees (original returns a Python list;
            # here it is a (B,) array).
            out["thetas"] = jnp.arccos(coslab_c) / math.pi * 180.0
        if self.with_weight:
            out["weight"] = self.weight
        return out


def _reference(x, w, label, scale, margin, thresh, mm):
    """Pure-JAX f32 reference matching the PyTorch forward."""
    ex = x / jnp.linalg.norm(x, axis=1, keepdims=True)
    ew = w / jnp.linalg.norm(w, axis=1, keepdims=True)
    cos = ex @ ew.T
    rows = jnp.arange(x.shape[0])
    coslab = cos[rows, label]
    a = jnp.zeros_like(cos).at[rows, label].set(
        jnp.where(coslab > thresh, margin, 0.0))
    b = jnp.zeros_like(cos).at[rows, label].set(
        jnp.where(coslab > thresh, 0.0, -mm))
    logits = scale * (jnp.cos(jnp.arccos(jnp.clip(cos, -1.0, 1.0)) + a) + b)
    thetas = jnp.arccos(jnp.clip(coslab, -1.0, 1.0)) / jnp.pi * 180.0
    return logits, thetas


if __name__ == "__main__":
    key = jax.random.PRNGKey(0)
    k_w, k_x, k_l = jax.random.split(key, 3)

    B, D, C = 8, 32, 16   # batch, in_features, out_features

    module = ArcFacePallas(
        in_features=D, out_features=C, scale=30.0, margin=0.5,
        with_theta=True, clip_thresh=0.0, clip_value=0.0, with_weight=True,
        key=k_w)

    x = jax.random.normal(k_x, (B, D), dtype=jnp.float32)
    label = jax.random.randint(k_l, (B,), 0, C, dtype=jnp.int32)

    out = module(x, label)
    jax.block_until_ready(out["logits"])
    jax.block_until_ready(out["thetas"])

    assert out["logits"].shape == (B, C)
    assert out["thetas"].shape == (B,)
    assert out["weight"].shape == (C, D)

    # Sanity check against the f32 reference (kernel matmul runs in bf16, so
    # tolerance is loose on logits).
    ref_logits, ref_thetas = _reference(
        x, module.weight, label, module.scale, module.margin,
        module.thresh, module.mm)
    assert jnp.allclose(out["logits"], ref_logits, atol=0.5), (
        float(jnp.max(jnp.abs(out["logits"] - ref_logits))))
    assert jnp.allclose(out["thetas"], ref_thetas, atol=1e-2)

    print("KERNEL_OK")
</pallas_src>

<mosaic_0001>
module attributes {stable_mosaic.version = 11 : i64} {
  func.func @_arcface_tile_kernel(%arg0: i32, %arg1: i32, %arg2: memref<16x32xbf16, #tpu.memory_space<vmem>>, %arg3: memref<32x128xbf16, #tpu.memory_space<vmem>>, %arg4: memref<16x1xi32, #tpu.memory_space<vmem>>, %arg5: memref<16x1xf32, #tpu.memory_space<vmem>>, %arg6: memref<16x128xf32, #tpu.memory_space<vmem>>) attributes {dimension_semantics = [#tpu.dimension_semantics<parallel>, #tpu.dimension_semantics<arbitrary>], iteration_bounds = array<i64: 1, 1>, scalar_prefetch = 0 : i64, scratch_operands = 0 : i64, tpu.core_type = #tpu.core_type<tc>, window_params = [{transform_indices = @transform_0, window_bounds = array<i64: 16, 32>}, {transform_indices = @transform_1, window_bounds = array<i64: 32, 128>}, {transform_indices = @transform_2, window_bounds = array<i64: 16, 1>}, {transform_indices = @transform_3, window_bounds = array<i64: 16, 1>}, {transform_indices = @transform_4, window_bounds = array<i64: 16, 128>}]} {
    %c0 = arith.constant 0 : index
    %c0_0 = arith.constant 0 : index
    %0 = vector.load %arg2[%c0, %c0_0] : memref<16x32xbf16, #tpu.memory_space<vmem>>, vector<16x32xbf16>
    %c0_1 = arith.constant 0 : index
    %c0_2 = arith.constant 0 : index
    %1 = vector.load %arg3[%c0_1, %c0_2] : memref<32x128xbf16, #tpu.memory_space<vmem>>, vector<32x128xbf16>
    %cst = arith.constant dense<0.000000e+00> : vector<16x128xf32>
    %2 = tpu.matmul %0, %1, %cst {dimension_numbers = #tpu.dot_dimension_numbers<[1], [0], [0], [1], [0, 0, 1, 1], [], []>} : vector<16x32xbf16>, vector<32x128xbf16>, vector<16x128xf32> -> vector<16x128xf32>
    %cst_3 = arith.constant -3.000000e+01 : f32
    %cst_4 = arith.constant 3.000000e+01 : f32
    %3 = vector.broadcast %cst_3 : f32 to vector<16x128xf32>
    %4 = arith.maximumf %3, %2 : vector<16x128xf32>
    %5 = vector.broadcast %cst_4 : f32 to vector<16x128xf32>
    %6 = arith.minimumf %5, %4 : vector<16x128xf32>
    %c0_5 = arith.constant 0 : index
    %c0_6 = arith.constant 0 : index
    %7 = vector.load %arg4[%c0_5, %c0_6] : memref<16x1xi32, #tpu.memory_space<vmem>>, vector<16x1xi32>
    %c128_i32 = arith.constant 128 : i32
    %8 = arith.muli %arg0, %c128_i32 : i32
    %9 = vector.broadcast %8 : i32 to vector<16x1xi32>
    %10 = arith.subi %7, %9 : vector<16x1xi32>
    %11 = tpu.iota {dimensions = array<i32: 1>} : vector<16x128xi32>
    %12 = vector.broadcast %10 : vector<16x1xi32> to vector<16x128xi32>
    %13 = arith.cmpi eq, %11, %12 : vector<16x128xi32>
    %c0_7 = arith.constant 0 : index
    %c0_8 = arith.constant 0 : index
    %14 = vector.load %arg5[%c0_7, %c0_8] : memref<16x1xf32, #tpu.memory_space<vmem>>, vector<16x1xf32>
    %cst_9 = arith.constant 0.000000e+00 : f32
    %15 = vector.shape_cast %14 : vector<16x1xf32> to vector<16x1xf32>
    %16 = vector.broadcast %15 : vector<16x1xf32> to vector<16x128xf32>
    %17 = vector.broadcast %cst_9 : f32 to vector<16x128xf32>
    %18 = arith.select %13, %16, %17 : vector<16x128xi1>, vector<16x128xf32>
    %19 = arith.addf %6, %18 : vector<16x128xf32>
    %c0_10 = arith.constant 0 : index
    %c0_11 = arith.constant 0 : index
    %20 = vector.load %arg6[%c0_10, %c0_11] : memref<16x128xf32, #tpu.memory_space<vmem>>, vector<16x128xf32>
    tpu.vector_store %arg6[%c0_10, %c0_11], %19 {strides = array<i32>} : memref<16x128xf32, #tpu.memory_space<vmem>>, vector<16x128xf32>,
    return
  }
  func.func @transform_0(%arg0: i32, %arg1: i32) -> (i32, i32) {
    %c0_i32 = arith.constant 0 : i32
    %c0_i32_0 = arith.constant 0 : i32
    return %arg1, %c0_i32 : i32, i32
  }
  func.func @transform_1(%arg0: i32, %arg1: i32) -> (i32, i32) {
    %c0_i32 = arith.constant 0 : i32
    %c0_i32_0 = arith.constant 0 : i32
    return %c0_i32, %arg0 : i32, i32
  }
  func.func @transform_2(%arg0: i32, %arg1: i32) -> (i32, i32) {
    %c0_i32 = arith.constant 0 : i32
    %c0_i32_0 = arith.constant 0 : i32
    return %arg1, %c0_i32 : i32, i32
  }
  func.func @transform_3(%arg0: i32, %arg1: i32) -> (i32, i32) {
    %c0_i32 = arith.constant 0 : i32
    %c0_i32_0 = arith.constant 0 : i32
    return %arg1, %c0_i32 : i32, i32
  }
  func.func @transform_4(%arg0: i32, %arg1: i32) -> (i32, i32) {
    %c0_i32 = arith.constant 0 : i32
    return %arg1, %arg0 : i32, i32
  }
}

</mosaic_0001>

<bundles_post_ra>
// kernel: tpu_custom_call.1
= control target key start
LH: loop header
LB: loop body
LE: loop exit
PB: predicated region body
PF: predicated region fallthrough
CT: control target
= control target key end

     0   :  { %v166_v1 = vmov 0   ;;  %s219_s0 = inlined_call_operand.vmem [shape: bf16[16,32], index: 0, kind: input, shape index: {}]   ;;  %s220_s1 = inlined_call_operand.vmem [shape: bf16[32,128], index: 1, kind: input, shape index: {}]   ;;  %s221_s2 = inlined_call_operand.vmem [shape: s32[16,1], index: 2, kind: input, shape index: {}]   ;;  %s222_s3 = inlined_call_operand.vmem [shape: f32[16,1], index: 3, kind: input, shape index: {}]   ;;  %s223_s4 = inlined_call_operand.hbm [shape: f32[16,128], index: 4, kind: output, shape index: {}]  }
   0x1   :  { %v133_v0 = vld [vmem:[%s220_s1 + $0x8] sm:$0xff]  ;;  %138 = vset.pattern.permute.xlu0 %v166_v1  ;;  %139 = vset.pattern.permute.xlu1 %v166_v1  ;;  %v64_v2 = vld [vmem:[%s221_s2] sm:$0xff] }
   0x2   :  { %v80_v3 = vld [vmem:[%s222_s3] sm:$0xff]  ;;  %52 = vmatpush.bf16.msra.mxu0 %v133_v0  ;;  %73 = vperm.xlu0 %138, %v64_v2  }
   0x3   :  { %v132_v4 = vld [vmem:[%s220_s1] sm:$0xff] }
   0x4   :  { %9 = vsyncpa [#allocation3], 0  ;;  %84 = vperm.xlu1 %139, %v80_v3   ;;  %v131_v5 = vld [vmem:[%s219_s0] sm:$0xff]  ;;  %vm42_vm0 = vcmask 261120   ;;  %v65_v6 = vld [vmem:[%s221_s2 + $0x8] sm:$0xff]  ;;  %v70_v8 = vlaneseq  ;;  %s167_s0 = smov [#allocation2]  }
   0x5   :  { %v81_v7 = vld [vmem:[%s222_s3 + $0x8] sm:$0xff]  ;;  %s102_s1 = sshll.u32 %s167_s0, 4  ;;  %s104_s29 = sshll.u32 %s223_s4, 4  ;;  %s103_s1 = int_to_ptr.vmem [resolvable:$true] %s102_s1  ;;  %s105_s29 = int_to_ptr.hbm [resolvable:$true] %s104_s29 }
   0x6   :  { %53 = vmatpush.bf16.msra.mxu0 %v132_v4  ;;  %v71_v9 = vand.u32 127, %v70_v8  ;;  %s168_s30 = smov 128   ;;  %s169_s5 = smov 8  }
   0x9   :  { %128 = vmatmul.msk.bf16.vlgmr.msra.gmra.mxu0 %vm42_vm0, %v131_v5 }
   0xa   :  { %76 = vperm.xlu0 %138, %v65_v6  }
   0xc   :  { %89 = vperm.xlu1 %139, %v81_v7  }
  0x74   :  { %v74_v10 = vpop.permute.xlu0 %73 }
  0x75   :  { %vm78_vm1 = vcmp.eq.s32.totalorder %v71_v9, %v74_v10 }
  0x76   :  { %v85_v11 = vpop.permute.xlu1 %84 }
  0x77   :  { %v92_v12 = vsel %vm78_vm1, %v85_v11, 0.0 }
  0x7c   :  { %v77_v16 = vpop.permute.xlu0 %76 }
  0x7d   :  { %vm79_vm2 = vcmp.eq.s32.totalorder %v71_v9, %v77_v16 }
  0x7e   :  { %v90_v17 = vpop.permute.xlu1 %89 }
  0x7f   :  { %v93_v20 = vsel %vm79_vm2, %v90_v17, 0.0 }
  0x86   :  { %v55_v13 = vpop.f32.mrf.mxu0 }
  0x87   :  { %v129_v14 = vclamps-f32 %v55_v13, 30.0 }
  0x89   :  { %v94_v15 = vadd.f32 %v129_v14, %v92_v12 }
  0x8b   :  { %96 = vst [vmem:[#allocation2] sm:$0xff] %v94_v15 }
  0x8e   :  { %v57_v18 = vpop.f32.mrf.mxu0 }
  0x8f   :  { %v130_v19 = vclamps-f32 %v57_v18, 30.0 }
  0x91   :  { %v95_v21 = vadd.f32 %v130_v19, %v93_v20 }
  0x93   :  { %97 = vst [vmem:[#allocation2 + $0x8] sm:$0xff] %v95_v21 }
  0x94   :  { %110 = dma.vmem_to_hbm [thread:$0]  %s103_s1, 256, %s105_s29, [#allocation3], %s168_s30, %s168_s30, %s169_s5  }
  0x95   :  { %164 = dma.done.wait [#allocation3], 256  }
  0x96   :  { %165 = vsyncadd [#allocation3], 4294967040 }
  0x97   :  { %115 = vsyncpa [#allocation3], 1 }

</bundles_post_ra>
